<compile_context>
chip_gen: v5e
topology: v5e:2x2
jax: 0.10.0
libtpu: 0.0.40
codegen_flags: <defaults>
</compile_context>

<pallas_src>
import jax
import jax.numpy as jnp
from jax.experimental import pallas as pl
from jax.experimental.pallas import tpu as pltpu

BN_EPS = 1e-5
LANE = 128
SUBLANE = 16  # bf16-friendly sublane multiple for the L axis


def _round_up(x, m):
    return (x + m - 1) // m * m


def _make_conv_stats_kernel(pre_affine, l_valid):
    """3-tap conv (pad=1, stride=1) over one batch row + per-channel partial BN sums.

    If `pre_affine`, first applies x <- relu(x * scale + shift) (fused BN+ReLU of the
    previous stage) before the convolution.
    """

    def kernel(*refs):
        if pre_affine:
            x_ref, scale_ref, shift_ref, w_ref, y_ref, s_ref = refs
        else:
            x_ref, w_ref, y_ref, s_ref = refs

        lp = x_ref.shape[1]
        x = x_ref[0].astype(jnp.float32)                      # (Lp, Cp), f32 VPU math
        if pre_affine:
            x = jnp.maximum(x * scale_ref[...] + shift_ref[...], 0.0)

        row = jax.lax.broadcasted_iota(jnp.int32, (lp, 1), 0)

        # Shifted taps via XLU rolls + edge masks (no misaligned slices, no re-padding).
        left = pltpu.roll(x, shift=1, axis=0)                 # row l -> x[l-1]
        left = jnp.where(row == 0, 0.0, left)                 # x[-1] == 0 (conv pad)
        right = pltpu.roll(x, shift=lp - 1, axis=0)           # row l -> x[l+1]
        right = jnp.where(row >= l_valid - 1, 0.0, right)     # x[L]  == 0 (conv pad)

        # im2col slab: single MXU matmul, K = 3*Cp, bf16 inputs, f32 accumulation.
        slab = jnp.concatenate([left, x, right], axis=-1).astype(jnp.bfloat16)
        y = jnp.dot(slab, w_ref[...], preferred_element_type=jnp.float32)  # (Lp, Cp)
        y_ref[0] = y.astype(y_ref.dtype)

        # Per-channel partial sums over VALID rows only (training-mode BN stats).
        valid = (row < l_valid).astype(jnp.float32)
        yv = y * valid
        s_ref[0, 0:1, :] = jnp.sum(yv, axis=0, keepdims=True)
        s_ref[0, 1:2, :] = jnp.sum(yv * yv, axis=0, keepdims=True)

    return kernel


def _finalize_kernel(y_ref, x_ref, scale_ref, shift_ref, out_ref):
    # out = relu(bn2(y2) + identity); single fused VPU pass, lane-dense store.
    out_ref[0] = jnp.maximum(
        y_ref[0] * scale_ref[...] + shift_ref[...] + x_ref[0], 0.0
    ).astype(out_ref.dtype)


def _bn_scale_shift(stats, gamma_p, beta_p, count):
    """Fold training-mode BN into one per-channel affine: y_norm = y*scale + shift."""
    s = jnp.sum(stats[:, 0, :], axis=0)
    ss = jnp.sum(stats[:, 1, :], axis=0)
    mean = s / count
    var = jnp.maximum(ss / count - mean * mean, 0.0)
    scale = gamma_p * jax.lax.rsqrt(var + BN_EPS)
    shift = beta_p - mean * scale
    return scale[None, :], shift[None, :]


@jax.jit
def basic_block_1d(x_ncl, w1, g1, b1, w2, g2, b2):
    """BasicBlock1D forward (training-mode BN), identity residual.

    x_ncl: (N, C, L) f32 (PyTorch layout).  w*: (C, C, 3) torch Conv1d weights.
    g*/b*: (C,) BatchNorm affine params.
    """
    N, C, L = x_ncl.shape
    # Fused identity-residual path: requires in_planes == planes, stride=1, no downsample.
    assert w1.shape == (C, C, 3) and w2.shape == (C, C, 3)
    assert g1.shape == (C,) and b1.shape == (C,) and g2.shape == (C,) and b2.shape == (C,)

    Cp = _round_up(C, LANE)
    Lp = _round_up(max(L, 2), SUBLANE)
    count = float(N * L)

    # NCL -> NLC (channels on the 128-lane axis); zero-pad C->Cp (lane-dense), L->Lp.
    x_nlc = jnp.transpose(x_ncl, (0, 2, 1))
    x_f32 = jnp.pad(x_nlc, ((0, 0), (0, Lp - L), (0, Cp - C)))
    x_bf16 = x_f32.astype(jnp.bfloat16)          # halves HBM bytes into pass 1

    def pack_weight(w):
        # (Cout, Cin, 3) -> (3, Cin, Cout), zero-pad channels, flatten to (3*Cp, Cp) bf16.
        wt = jnp.transpose(w, (2, 1, 0))
        wp = jnp.zeros((3, Cp, Cp), jnp.float32).at[:, :C, :C].set(wt)
        return wp.reshape(3 * Cp, Cp).astype(jnp.bfloat16)

    w1_p, w2_p = pack_weight(w1), pack_weight(w2)
    g1_p = jnp.zeros((Cp,), jnp.float32).at[:C].set(g1)
    b1_p = jnp.zeros((Cp,), jnp.float32).at[:C].set(b1)
    g2_p = jnp.zeros((Cp,), jnp.float32).at[:C].set(g2)
    b2_p = jnp.zeros((Cp,), jnp.float32).at[:C].set(b2)

    # BlockSpecs: one batch row per grid step (grid over N, "parallel" -> megacore).
    row_spec = pl.BlockSpec((1, Lp, Cp), lambda n: (n, 0, 0))
    w_spec = pl.BlockSpec((3 * Cp, Cp), lambda n: (0, 0))
    vec_spec = pl.BlockSpec((1, Cp), lambda n: (0, 0))
    stat_spec = pl.BlockSpec((1, 2, Cp), lambda n: (n, 0, 0))

    xb = Lp * Cp * 2          # bf16 input block
    yb = Lp * Cp * 4          # f32 conv-output block
    wb = 3 * Cp * Cp * 2      # bf16 packed weight
    sb = 2 * Cp * 4           # stats block
    vb = Cp * 4               # scale/shift vector

    def params(block_bytes):
        # double-buffered blocks + headroom for in-kernel temporaries; cap at v7x VMEM.
        return pltpu.CompilerParams(
            dimension_semantics=("parallel",),
            vmem_limit_bytes=int(min(64 << 20, 2 * block_bytes + (8 << 20))),
        )

    conv_out_shapes = (jax.ShapeDtypeStruct((N, Lp, Cp), jnp.float32),
                       jax.ShapeDtypeStruct((N, 2, Cp), jnp.float32))

    # ---- pass 1: y1 = conv1(x), partial BN1 stats -------------------------------------
    y1, s1 = pl.pallas_call(
        _make_conv_stats_kernel(pre_affine=False, l_valid=L),
        grid=(N,),
        in_specs=[row_spec, w_spec],
        out_specs=(row_spec, stat_spec),
        out_shape=conv_out_shapes,
        compiler_params=params(xb + wb + yb + sb),
    )(x_bf16, w1_p)

    scale1, shift1 = _bn_scale_shift(s1, g1_p, b1_p, count)

    # ---- pass 2: y2 = conv2(relu(bn1(y1))), partial BN2 stats --------------------------
    y2, s2 = pl.pallas_call(
        _make_conv_stats_kernel(pre_affine=True, l_valid=L),
        grid=(N,),
        in_specs=[row_spec, vec_spec, vec_spec, w_spec],
        out_specs=(row_spec, stat_spec),
        out_shape=conv_out_shapes,
        compiler_params=params(yb + 2 * vb + wb + yb + sb),
    )(y1, scale1, shift1, w2_p)

    scale2, shift2 = _bn_scale_shift(s2, g2_p, b2_p, count)

    # ---- pass 3: out = relu(bn2(y2) + identity) ----------------------------------------
    out_p = pl.pallas_call(
        _finalize_kernel,
        grid=(N,),
        in_specs=[row_spec, row_spec, vec_spec, vec_spec],
        out_specs=row_spec,
        out_shape=jax.ShapeDtypeStruct((N, Lp, Cp), jnp.float32),
        compiler_params=params(3 * yb + 2 * vb),
    )(y2, x_f32, scale2, shift2)

    # Drop channel/length padding, back to NCL.
    return jnp.transpose(out_p[:, :L, :C], (0, 2, 1))


def reference_forward(x_ncl, w1, g1, b1, w2, g2, b2):
    """Pure-JAX f32 reference matching nn.Conv1d / nn.BatchNorm1d (training-mode) forward."""
    def conv(x, w):
        return jax.lax.conv_general_dilated(
            x, w, window_strides=(1,), padding=((1, 1),),
            dimension_numbers=("NCH", "OIH", "NCH"))

    def bn(y, g, b):
        mean = y.mean(axis=(0, 2), keepdims=True)
        var = ((y - mean) ** 2).mean(axis=(0, 2), keepdims=True)
        return (y - mean) * jax.lax.rsqrt(var + BN_EPS) * g[None, :, None] + b[None, :, None]

    out = jnp.maximum(bn(conv(x_ncl, w1), g1, b1), 0.0)
    out = bn(conv(out, w2), g2, b2)
    return jnp.maximum(out + x_ncl, 0.0)


if __name__ == "__main__":
    N, C, L = 2, 8, 16  # in_planes == planes, stride=1, downsample=None

    key = jax.random.PRNGKey(0)
    kx, kw1, kw2, kg1, kb1, kg2, kb2 = jax.random.split(key, 7)

    x = jax.random.normal(kx, (N, C, L), jnp.float32)
    w1 = jax.random.normal(kw1, (C, C, 3), jnp.float32) * 0.2
    w2 = jax.random.normal(kw2, (C, C, 3), jnp.float32) * 0.2
    g1 = 1.0 + 0.1 * jax.random.normal(kg1, (C,), jnp.float32)
    b1 = 0.1 * jax.random.normal(kb1, (C,), jnp.float32)
    g2 = 1.0 + 0.1 * jax.random.normal(kg2, (C,), jnp.float32)
    b2 = 0.1 * jax.random.normal(kb2, (C,), jnp.float32)

    out = jax.block_until_ready(basic_block_1d(x, w1, g1, b1, w2, g2, b2))
    ref = jax.block_until_ready(reference_forward(x, w1, g1, b1, w2, g2, b2))

    assert out.shape == (N, C, L)
    # bf16 MXU inputs vs. f32 reference -> bf16-appropriate tolerance (structural bugs
    # would produce O(0.1..1) errors, far above this).
    if not jnp.allclose(out, ref, atol=3e-2, rtol=3e-2):
        err = float(jnp.max(jnp.abs(out - ref)))
        raise AssertionError(f"Pallas kernel output mismatches JAX reference (max abs err {err})")

    print("KERNEL_OK")
</pallas_src>

<mosaic_0001>
module attributes {stable_mosaic.version = 11 : i64} {
  func.func @kernel(%arg0: i32, %arg1: memref<1x16x128xbf16, #tpu.memory_space<vmem>>, %arg2: memref<384x128xbf16, #tpu.memory_space<vmem>>, %arg3: memref<1x16x128xf32, #tpu.memory_space<vmem>>, %arg4: memref<1x2x128xf32, #tpu.memory_space<vmem>>) attributes {dimension_semantics = [#tpu.dimension_semantics<parallel>], iteration_bounds = array<i64: 2>, scalar_prefetch = 0 : i64, scratch_operands = 0 : i64, tpu.core_type = #tpu.core_type<tc>, window_params = [{transform_indices = @transform_0, window_bounds = array<i64: 1, 16, 128>}, {pipeline_mode = #tpu.pipeline_mode<synchronous>, transform_indices = @transform_1, window_bounds = array<i64: 384, 128>}, {transform_indices = @transform_2, window_bounds = array<i64: 1, 16, 128>}, {transform_indices = @transform_3, window_bounds = array<i64: 1, 2, 128>}]} {
    %c0 = arith.constant 0 : index
    %c0_0 = arith.constant 0 : index
    %c0_1 = arith.constant 0 : index
    %0 = vector.load %arg1[%c0, %c0_0, %c0_1] : memref<1x16x128xbf16, #tpu.memory_space<vmem>>, vector<1x16x128xbf16>
    %1 = vector.shape_cast %0 : vector<1x16x128xbf16> to vector<16x128xbf16>
    %2 = arith.extf %1 : vector<16x128xbf16> to vector<16x128xf32>
    %3 = tpu.iota {dimensions = array<i32: 0>} : vector<16x1xi32>
    %c1_i32 = arith.constant 1 : i32
    %4 = tpu.dynamic_rotate %2 by %c1_i32 dim 0 : vector<16x128xf32>, i32 -> vector<16x128xf32>
    %c0_i32 = arith.constant 0 : i32
    %5 = vector.broadcast %c0_i32 : i32 to vector<16x1xi32>
    %6 = arith.cmpi eq, %3, %5 : vector<16x1xi32>
    %cst = arith.constant 0.000000e+00 : f32
    %7 = vector.shape_cast %6 : vector<16x1xi1> to vector<16x1xi1>
    %8 = vector.broadcast %7 : vector<16x1xi1> to vector<16x128xi1>
    %9 = vector.broadcast %cst : f32 to vector<16x128xf32>
    %10 = arith.select %8, %9, %4 : vector<16x128xi1>, vector<16x128xf32>
    %c15_i32 = arith.constant 15 : i32
    %11 = tpu.dynamic_rotate %2 by %c15_i32 dim 0 : vector<16x128xf32>, i32 -> vector<16x128xf32>
    %c15_i32_2 = arith.constant 15 : i32
    %12 = vector.broadcast %c15_i32_2 : i32 to vector<16x1xi32>
    %13 = arith.cmpi sge, %3, %12 : vector<16x1xi32>
    %cst_3 = arith.constant 0.000000e+00 : f32
    %14 = vector.shape_cast %13 : vector<16x1xi1> to vector<16x1xi1>
    %15 = vector.broadcast %14 : vector<16x1xi1> to vector<16x128xi1>
    %16 = vector.broadcast %cst_3 : f32 to vector<16x128xf32>
    %17 = arith.select %15, %16, %11 : vector<16x128xi1>, vector<16x128xf32>
    %18 = tpu.concatenate %10, %2, %17 in 1 : vector<16x128xf32>, vector<16x128xf32>, vector<16x128xf32> -> vector<16x384xf32>
    %19 = arith.truncf %18 : vector<16x384xf32> to vector<16x384xbf16>
    %c0_4 = arith.constant 0 : index
    %c0_5 = arith.constant 0 : index
    %20 = vector.load %arg2[%c0_4, %c0_5] : memref<384x128xbf16, #tpu.memory_space<vmem>>, vector<384x128xbf16>
    %cst_6 = arith.constant dense<0.000000e+00> : vector<16x128xf32>
    %21 = tpu.matmul %19, %20, %cst_6 {dimension_numbers = #tpu.dot_dimension_numbers<[1], [0], [0], [1], [0, 0, 1, 1], [], []>} : vector<16x384xbf16>, vector<384x128xbf16>, vector<16x128xf32> -> vector<16x128xf32>
    %c0_7 = arith.constant 0 : index
    %c0_8 = arith.constant 0 : index
    %c0_9 = arith.constant 0 : index
    %22 = vector.load %arg3[%c0_7, %c0_8, %c0_9] : memref<1x16x128xf32, #tpu.memory_space<vmem>>, vector<1x16x128xf32>
    %23 = vector.shape_cast %22 : vector<1x16x128xf32> to vector<16x128xf32>
    %24 = vector.shape_cast %21 : vector<16x128xf32> to vector<1x16x128xf32>
    tpu.vector_store %arg3[%c0_7, %c0_8, %c0_9], %24 {strides = array<i32>} : memref<1x16x128xf32, #tpu.memory_space<vmem>>, vector<1x16x128xf32>,
    %c16_i32 = arith.constant 16 : i32
    %25 = vector.broadcast %c16_i32 : i32 to vector<16x1xi32>
    %26 = arith.cmpi slt, %3, %25 : vector<16x1xi32>
    %27 = arith.extui %26 : vector<16x1xi1> to vector<16x1xi32>
    %28 = arith.sitofp %27 : vector<16x1xi32> to vector<16x1xf32>
    %29 = vector.broadcast %28 : vector<16x1xf32> to vector<16x128xf32>
    %30 = arith.mulf %21, %29 : vector<16x128xf32>
    %cst_10 = arith.constant dense<0.000000e+00> : vector<128xf32>
    %31 = vector.multi_reduction <add>, %30, %cst_10 [0] : vector<16x128xf32> to vector<128xf32>
    %32 = vector.shape_cast %31 : vector<128xf32> to vector<1x128xf32>
    %c0_11 = arith.constant 0 : index
    %c0_12 = arith.constant 0 : index
    %c0_13 = arith.constant 0 : index
    %33 = vector.load %arg4[%c0_11, %c0_12, %c0_13] : memref<1x2x128xf32, #tpu.memory_space<vmem>>, vector<1x1x128xf32>
    %34 = vector.shape_cast %33 : vector<1x1x128xf32> to vector<1x128xf32>
    %35 = vector.shape_cast %32 : vector<1x128xf32> to vector<1x1x128xf32>
    tpu.vector_store %arg4[%c0_11, %c0_12, %c0_13], %35 {strides = array<i32>} : memref<1x2x128xf32, #tpu.memory_space<vmem>>, vector<1x1x128xf32>,
    %36 = arith.mulf %30, %30 : vector<16x128xf32>
    %cst_14 = arith.constant dense<0.000000e+00> : vector<128xf32>
    %37 = vector.multi_reduction <add>, %36, %cst_14 [0] : vector<16x128xf32> to vector<128xf32>
    %38 = vector.shape_cast %37 : vector<128xf32> to vector<1x128xf32>
    %c0_15 = arith.constant 0 : index
    %c1 = arith.constant 1 : index
    %c0_16 = arith.constant 0 : index
    %39 = vector.load %arg4[%c0_15, %c1, %c0_16] : memref<1x2x128xf32, #tpu.memory_space<vmem>>, vector<1x1x128xf32>
    %40 = vector.shape_cast %39 : vector<1x1x128xf32> to vector<1x128xf32>
    %41 = vector.shape_cast %38 : vector<1x128xf32> to vector<1x1x128xf32>
    tpu.vector_store %arg4[%c0_15, %c1, %c0_16], %41 {strides = array<i32>} : memref<1x2x128xf32, #tpu.memory_space<vmem>>, vector<1x1x128xf32>,
    return
  }
  func.func @transform_0(%arg0: i32) -> (i32, i32, i32) {
    %c0_i32 = arith.constant 0 : i32
    %c0_i32_0 = arith.constant 0 : i32
    %c0_i32_1 = arith.constant 0 : i32
    return %arg0, %c0_i32, %c0_i32_0 : i32, i32, i32
  }
  func.func @transform_1(%arg0: i32) -> (i32, i32) {
    %c0_i32 = arith.constant 0 : i32
    %c0_i32_0 = arith.constant 0 : i32
    %c0_i32_1 = arith.constant 0 : i32
    return %c0_i32, %c0_i32_0 : i32, i32
  }
  func.func @transform_2(%arg0: i32) -> (i32, i32, i32) {
    %c0_i32 = arith.constant 0 : i32
    %c0_i32_0 = arith.constant 0 : i32
    %c0_i32_1 = arith.constant 0 : i32
    return %arg0, %c0_i32, %c0_i32_0 : i32, i32, i32
  }
  func.func @transform_3(%arg0: i32) -> (i32, i32, i32) {
    %c0_i32 = arith.constant 0 : i32
    %c0_i32_0 = arith.constant 0 : i32
    %c0_i32_1 = arith.constant 0 : i32
    return %arg0, %c0_i32, %c0_i32_0 : i32, i32, i32
  }
}

module attributes {stable_mosaic.version = 11 : i64} {
  func.func @kernel(%arg0: i32, %arg1: memref<1x16x128xf32, #tpu.memory_space<vmem>>, %arg2: memref<1x128xf32, #tpu.memory_space<vmem>>, %arg3: memref<1x128xf32, #tpu.memory_space<vmem>>, %arg4: memref<384x128xbf16, #tpu.memory_space<vmem>>, %arg5: memref<1x16x128xf32, #tpu.memory_space<vmem>>, %arg6: memref<1x2x128xf32, #tpu.memory_space<vmem>>) attributes {dimension_semantics = [#tpu.dimension_semantics<parallel>], iteration_bounds = array<i64: 2>, scalar_prefetch = 0 : i64, scratch_operands = 0 : i64, tpu.core_type = #tpu.core_type<tc>, window_params = [{transform_indices = @transform_0, window_bounds = array<i64: 1, 16, 128>}, {pipeline_mode = #tpu.pipeline_mode<synchronous>, transform_indices = @transform_1, window_bounds = array<i64: 1, 128>}, {pipeline_mode = #tpu.pipeline_mode<synchronous>, transform_indices = @transform_2, window_bounds = array<i64: 1, 128>}, {pipeline_mode = #tpu.pipeline_mode<synchronous>, transform_indices = @transform_3, window_bounds = array<i64: 384, 128>}, {transform_indices = @transform_4, window_bounds = array<i64: 1, 16, 128>}, {transform_indices = @transform_5, window_bounds = array<i64: 1, 2, 128>}]} {
    %c0 = arith.constant 0 : index
    %c0_0 = arith.constant 0 : index
    %c0_1 = arith.constant 0 : index
    %0 = vector.load %arg1[%c0, %c0_0, %c0_1] : memref<1x16x128xf32, #tpu.memory_space<vmem>>, vector<1x16x128xf32>
    %1 = vector.shape_cast %0 : vector<1x16x128xf32> to vector<16x128xf32>
    %c0_2 = arith.constant 0 : index
    %c0_3 = arith.constant 0 : index
    %2 = vector.load %arg2[%c0_2, %c0_3] : memref<1x128xf32, #tpu.memory_space<vmem>>, vector<1x128xf32>
    %3 = vector.broadcast %2 : vector<1x128xf32> to vector<16x128xf32>
    %4 = arith.mulf %1, %3 : vector<16x128xf32>
    %c0_4 = arith.constant 0 : index
    %c0_5 = arith.constant 0 : index
    %5 = vector.load %arg3[%c0_4, %c0_5] : memref<1x128xf32, #tpu.memory_space<vmem>>, vector<1x128xf32>
    %6 = vector.broadcast %5 : vector<1x128xf32> to vector<16x128xf32>
    %7 = arith.addf %4, %6 : vector<16x128xf32>
    %cst = arith.constant 0.000000e+00 : f32
    %8 = vector.broadcast %cst : f32 to vector<16x128xf32>
    %9 = arith.maximumf %7, %8 : vector<16x128xf32>
    %10 = tpu.iota {dimensions = array<i32: 0>} : vector<16x1xi32>
    %c1_i32 = arith.constant 1 : i32
    %11 = tpu.dynamic_rotate %9 by %c1_i32 dim 0 : vector<16x128xf32>, i32 -> vector<16x128xf32>
    %c0_i32 = arith.constant 0 : i32
    %12 = vector.broadcast %c0_i32 : i32 to vector<16x1xi32>
    %13 = arith.cmpi eq, %10, %12 : vector<16x1xi32>
    %cst_6 = arith.constant 0.000000e+00 : f32
    %14 = vector.shape_cast %13 : vector<16x1xi1> to vector<16x1xi1>
    %15 = vector.broadcast %14 : vector<16x1xi1> to vector<16x128xi1>
    %16 = vector.broadcast %cst_6 : f32 to vector<16x128xf32>
    %17 = arith.select %15, %16, %11 : vector<16x128xi1>, vector<16x128xf32>
    %c15_i32 = arith.constant 15 : i32
    %18 = tpu.dynamic_rotate %9 by %c15_i32 dim 0 : vector<16x128xf32>, i32 -> vector<16x128xf32>
    %c15_i32_7 = arith.constant 15 : i32
    %19 = vector.broadcast %c15_i32_7 : i32 to vector<16x1xi32>
    %20 = arith.cmpi sge, %10, %19 : vector<16x1xi32>
    %cst_8 = arith.constant 0.000000e+00 : f32
    %21 = vector.shape_cast %20 : vector<16x1xi1> to vector<16x1xi1>
    %22 = vector.broadcast %21 : vector<16x1xi1> to vector<16x128xi1>
    %23 = vector.broadcast %cst_8 : f32 to vector<16x128xf32>
    %24 = arith.select %22, %23, %18 : vector<16x128xi1>, vector<16x128xf32>
    %25 = tpu.concatenate %17, %9, %24 in 1 : vector<16x128xf32>, vector<16x128xf32>, vector<16x128xf32> -> vector<16x384xf32>
    %26 = arith.truncf %25 : vector<16x384xf32> to vector<16x384xbf16>
    %c0_9 = arith.constant 0 : index
    %c0_10 = arith.constant 0 : index
    %27 = vector.load %arg4[%c0_9, %c0_10] : memref<384x128xbf16, #tpu.memory_space<vmem>>, vector<384x128xbf16>
    %cst_11 = arith.constant dense<0.000000e+00> : vector<16x128xf32>
    %28 = tpu.matmul %26, %27, %cst_11 {dimension_numbers = #tpu.dot_dimension_numbers<[1], [0], [0], [1], [0, 0, 1, 1], [], []>} : vector<16x384xbf16>, vector<384x128xbf16>, vector<16x128xf32> -> vector<16x128xf32>
    %c0_12 = arith.constant 0 : index
    %c0_13 = arith.constant 0 : index
    %c0_14 = arith.constant 0 : index
    %29 = vector.load %arg5[%c0_12, %c0_13, %c0_14] : memref<1x16x128xf32, #tpu.memory_space<vmem>>, vector<1x16x128xf32>
    %30 = vector.shape_cast %29 : vector<1x16x128xf32> to vector<16x128xf32>
    %31 = vector.shape_cast %28 : vector<16x128xf32> to vector<1x16x128xf32>
    tpu.vector_store %arg5[%c0_12, %c0_13, %c0_14], %31 {strides = array<i32>} : memref<1x16x128xf32, #tpu.memory_space<vmem>>, vector<1x16x128xf32>,
    %c16_i32 = arith.constant 16 : i32
    %32 = vector.broadcast %c16_i32 : i32 to vector<16x1xi32>
    %33 = arith.cmpi slt, %10, %32 : vector<16x1xi32>
    %34 = arith.extui %33 : vector<16x1xi1> to vector<16x1xi32>
    %35 = arith.sitofp %34 : vector<16x1xi32> to vector<16x1xf32>
    %36 = vector.broadcast %35 : vector<16x1xf32> to vector<16x128xf32>
    %37 = arith.mulf %28, %36 : vector<16x128xf32>
    %cst_15 = arith.constant dense<0.000000e+00> : vector<128xf32>
    %38 = vector.multi_reduction <add>, %37, %cst_15 [0] : vector<16x128xf32> to vector<128xf32>
    %39 = vector.shape_cast %38 : vector<128xf32> to vector<1x128xf32>
    %c0_16 = arith.constant 0 : index
    %c0_17 = arith.constant 0 : index
    %c0_18 = arith.constant 0 : index
    %40 = vector.load %arg6[%c0_16, %c0_17, %c0_18] : memref<1x2x128xf32, #tpu.memory_space<vmem>>, vector<1x1x128xf32>
    %41 = vector.shape_cast %40 : vector<1x1x128xf32> to vector<1x128xf32>
    %42 = vector.shape_cast %39 : vector<1x128xf32> to vector<1x1x128xf32>
    tpu.vector_store %arg6[%c0_16, %c0_17, %c0_18], %42 {strides = array<i32>} : memref<1x2x128xf32, #tpu.memory_space<vmem>>, vector<1x1x128xf32>,
    %43 = arith.mulf %37, %37 : vector<16x128xf32>
    %cst_19 = arith.constant dense<0.000000e+00> : vector<128xf32>
    %44 = vector.multi_reduction <add>, %43, %cst_19 [0] : vector<16x128xf32> to vector<128xf32>
    %45 = vector.shape_cast %44 : vector<128xf32> to vector<1x128xf32>
    %c0_20 = arith.constant 0 : index
    %c1 = arith.constant 1 : index
    %c0_21 = arith.constant 0 : index
    %46 = vector.load %arg6[%c0_20, %c1, %c0_21] : memref<1x2x128xf32, #tpu.memory_space<vmem>>, vector<1x1x128xf32>
    %47 = vector.shape_cast %46 : vector<1x1x128xf32> to vector<1x128xf32>
    %48 = vector.shape_cast %45 : vector<1x128xf32> to vector<1x1x128xf32>
    tpu.vector_store %arg6[%c0_20, %c1, %c0_21], %48 {strides = array<i32>} : memref<1x2x128xf32, #tpu.memory_space<vmem>>, vector<1x1x128xf32>,
    return
  }
  func.func @transform_0(%arg0: i32) -> (i32, i32, i32) {
    %c0_i32 = arith.constant 0 : i32
    %c0_i32_0 = arith.constant 0 : i32
    %c0_i32_1 = arith.constant 0 : i32
    return %arg0, %c0_i32, %c0_i32_0 : i32, i32, i32
  }
  func.func @transform_1(%arg0: i32) -> (i32, i32) {
    %c0_i32 = arith.constant 0 : i32
    %c0_i32_0 = arith.constant 0 : i32
    %c0_i32_1 = arith.constant 0 : i32
    return %c0_i32, %c0_i32_0 : i32, i32
  }
  func.func @transform_2(%arg0: i32) -> (i32, i32) {
    %c0_i32 = arith.constant 0 : i32
    %c0_i32_0 = arith.constant 0 : i32
    %c0_i32_1 = arith.constant 0 : i32
    return %c0_i32, %c0_i32_0 : i32, i32
  }
  func.func @transform_3(%arg0: i32) -> (i32, i32) {
    %c0_i32 = arith.constant 0 : i32
    %c0_i32_0 = arith.constant 0 : i32
    %c0_i32_1 = arith.constant 0 : i32
    return %c0_i32, %c0_i32_0 : i32, i32
  }
  func.func @transform_4(%arg0: i32) -> (i32, i32, i32) {
    %c0_i32 = arith.constant 0 : i32
    %c0_i32_0 = arith.constant 0 : i32
    %c0_i32_1 = arith.constant 0 : i32
    return %arg0, %c0_i32, %c0_i32_0 : i32, i32, i32
  }
  func.func @transform_5(%arg0: i32) -> (i32, i32, i32) {
    %c0_i32 = arith.constant 0 : i32
    %c0_i32_0 = arith.constant 0 : i32
    %c0_i32_1 = arith.constant 0 : i32
    return %arg0, %c0_i32, %c0_i32_0 : i32, i32, i32
  }
}

module attributes {stable_mosaic.version = 11 : i64} {
  func.func @_finalize_kernel(%arg0: i32, %arg1: memref<1x16x128xf32, #tpu.memory_space<vmem>>, %arg2: memref<1x16x128xf32, #tpu.memory_space<vmem>>, %arg3: memref<1x128xf32, #tpu.memory_space<vmem>>, %arg4: memref<1x128xf32, #tpu.memory_space<vmem>>, %arg5: memref<1x16x128xf32, #tpu.memory_space<vmem>>) attributes {dimension_semantics = [#tpu.dimension_semantics<parallel>], iteration_bounds = array<i64: 2>, scalar_prefetch = 0 : i64, scratch_operands = 0 : i64, tpu.core_type = #tpu.core_type<tc>, window_params = [{transform_indices = @transform_0, window_bounds = array<i64: 1, 16, 128>}, {transform_indices = @transform_1, window_bounds = array<i64: 1, 16, 128>}, {pipeline_mode = #tpu.pipeline_mode<synchronous>, transform_indices = @transform_2, window_bounds = array<i64: 1, 128>}, {pipeline_mode = #tpu.pipeline_mode<synchronous>, transform_indices = @transform_3, window_bounds = array<i64: 1, 128>}, {transform_indices = @transform_4, window_bounds = array<i64: 1, 16, 128>}]} {
    %c0 = arith.constant 0 : index
    %c0_0 = arith.constant 0 : index
    %c0_1 = arith.constant 0 : index
    %0 = vector.load %arg1[%c0, %c0_0, %c0_1] : memref<1x16x128xf32, #tpu.memory_space<vmem>>, vector<1x16x128xf32>
    %1 = vector.shape_cast %0 : vector<1x16x128xf32> to vector<16x128xf32>
    %c0_2 = arith.constant 0 : index
    %c0_3 = arith.constant 0 : index
    %2 = vector.load %arg3[%c0_2, %c0_3] : memref<1x128xf32, #tpu.memory_space<vmem>>, vector<1x128xf32>
    %3 = vector.broadcast %2 : vector<1x128xf32> to vector<16x128xf32>
    %4 = arith.mulf %1, %3 : vector<16x128xf32>
    %c0_4 = arith.constant 0 : index
    %c0_5 = arith.constant 0 : index
    %5 = vector.load %arg4[%c0_4, %c0_5] : memref<1x128xf32, #tpu.memory_space<vmem>>, vector<1x128xf32>
    %6 = vector.broadcast %5 : vector<1x128xf32> to vector<16x128xf32>
    %7 = arith.addf %4, %6 : vector<16x128xf32>
    %c0_6 = arith.constant 0 : index
    %c0_7 = arith.constant 0 : index
    %c0_8 = arith.constant 0 : index
    %8 = vector.load %arg2[%c0_6, %c0_7, %c0_8] : memref<1x16x128xf32, #tpu.memory_space<vmem>>, vector<1x16x128xf32>
    %9 = vector.shape_cast %8 : vector<1x16x128xf32> to vector<16x128xf32>
    %10 = arith.addf %7, %9 : vector<16x128xf32>
    %cst = arith.constant 0.000000e+00 : f32
    %11 = vector.broadcast %cst : f32 to vector<16x128xf32>
    %12 = arith.maximumf %10, %11 : vector<16x128xf32>
    %c0_9 = arith.constant 0 : index
    %c0_10 = arith.constant 0 : index
    %c0_11 = arith.constant 0 : index
    %13 = vector.load %arg5[%c0_9, %c0_10, %c0_11] : memref<1x16x128xf32, #tpu.memory_space<vmem>>, vector<1x16x128xf32>
    %14 = vector.shape_cast %13 : vector<1x16x128xf32> to vector<16x128xf32>
    %15 = vector.shape_cast %12 : vector<16x128xf32> to vector<1x16x128xf32>
    tpu.vector_store %arg5[%c0_9, %c0_10, %c0_11], %15 {strides = array<i32>} : memref<1x16x128xf32, #tpu.memory_space<vmem>>, vector<1x16x128xf32>,
    return
  }
  func.func @transform_0(%arg0: i32) -> (i32, i32, i32) {
    %c0_i32 = arith.constant 0 : i32
    %c0_i32_0 = arith.constant 0 : i32
    %c0_i32_1 = arith.constant 0 : i32
    return %arg0, %c0_i32, %c0_i32_0 : i32, i32, i32
  }
  func.func @transform_1(%arg0: i32) -> (i32, i32, i32) {
    %c0_i32 = arith.constant 0 : i32
    %c0_i32_0 = arith.constant 0 : i32
    %c0_i32_1 = arith.constant 0 : i32
    return %arg0, %c0_i32, %c0_i32_0 : i32, i32, i32
  }
  func.func @transform_2(%arg0: i32) -> (i32, i32) {
    %c0_i32 = arith.constant 0 : i32
    %c0_i32_0 = arith.constant 0 : i32
    %c0_i32_1 = arith.constant 0 : i32
    return %c0_i32, %c0_i32_0 : i32, i32
  }
  func.func @transform_3(%arg0: i32) -> (i32, i32) {
    %c0_i32 = arith.constant 0 : i32
    %c0_i32_0 = arith.constant 0 : i32
    %c0_i32_1 = arith.constant 0 : i32
    return %c0_i32, %c0_i32_0 : i32, i32
  }
  func.func @transform_4(%arg0: i32) -> (i32, i32, i32) {
    %c0_i32 = arith.constant 0 : i32
    %c0_i32_0 = arith.constant 0 : i32
    %c0_i32_1 = arith.constant 0 : i32
    return %arg0, %c0_i32, %c0_i32_0 : i32, i32, i32
  }
}

</mosaic_0001>

<bundles_post_ra>
// kernel: basic_block_1d.5
= control target key start
LH: loop header
LB: loop body
LE: loop exit
PB: predicated region body
PF: predicated region fallthrough
CT: control target
= control target key end

     0   :  { %s366_s15 = smov 0   ;;  %s392_s0 = inlined_call_operand.vmem [shape: f32[2,16,128], index: 0, kind: input, shape index: {}]   ;;  %s393_s1 = inlined_call_operand.vmem [shape: f32[2,16,128], index: 1, kind: input, shape index: {}]   ;;  %s394_s2 = inlined_call_operand.vmem [shape: f32[1,128], index: 2, kind: input, shape index: {}]   ;;  %s395_s3 = inlined_call_operand.vmem [shape: f32[1,128], index: 3, kind: input, shape index: {}]   ;;  %s396_s4 = inlined_call_operand.vmem [shape: f32[2,16,128], index: 4, kind: output, shape index: {}]  }
   0x1 LB: > { %s307_s16 = sadd.s32 4294967295, %s339_s15   ;;  %p311_p0 = scmp.ge.s32.totalorder %s339_s15, 1  ;;  %s339_s15 = sphi %s366_s15, %s14_s15  }
   0x2   : > { %p172_p1 = scmp.lt.s32.totalorder %s339_s15, 3 }
   0x4   : > { %p173_p2 = pnand %p311_p0, %p172_p1 }
   0x5   : > { %p203_p3 = scmp.lt.s32.totalorder (!%p173_p2), %s307_s16, 1 }
   0x6   : > { %176 = sbr.rel (%p173_p2) target bundleno = 25 (0x19), region = 36 }
   0xb   : > { %s398_s16 = smov (!%p203_p3, %s307_s16), 1  ;;  %v331_v0 = vld [vmem:[%s394_s2] ss:$0 sm:$0xff] }
   0xc   : > { %s320_s19 = sshll.u32 %s398_s16, 4  ;;  %v332_v1 = vld [vmem:[%s395_s3] ss:$0 sm:$0xff] }
   0xd   : > { %s207_s22 = scalar_lea.vmem %s392_s0, %s320_s19  ;;  %s212_s25 = scalar_lea.vmem %s393_s1, %s320_s19 }
   0xe   : > { %v218_v2 = vld [vmem:[%s207_s22] sm:$0xff]  ;;  %v219_v3 = vld [vmem:[%s207_s22 + $0x8] sm:$0xff]  ;;  %s217_s30 = scalar_lea.vmem %s396_s4, %s320_s19 }
   0xf   : > { %v224_v4 = vmul.f32 %v331_v0, %v218_v2  ;;  %v225_v5 = vmul.f32 %v331_v0, %v219_v3  ;;  %v232_v6 = vld [vmem:[%s212_s25] sm:$0xff]  ;;  %v233_v7 = vld [vmem:[%s212_s25 + $0x8] sm:$0xff] }
  0x11   : > { %v230_v8 = vadd.f32 %v332_v1, %v224_v4  ;;  %v231_v9 = vadd.f32 %v332_v1, %v225_v5 }
  0x13   : > { %v234_v10 = vadd.f32 %v232_v6, %v230_v8  ;;  %v235_v11 = vadd.f32 %v233_v7, %v231_v9 }
  0x15   : > { %v236_v12 = vmax.f32 %v234_v10, 0.0  ;;  %v237_v13 = vmax.f32 %v235_v11, 0.0 }
  0x17   : > { %238 = vst [vmem:[%s217_s30] sm:$0xff] %v236_v12 }
  0x18   : > { %239 = vst [vmem:[%s217_s30 + $0x8] sm:$0xff] %v237_v13 }
  0x19 PF: > { %s14_s15 = sadd.s32 1, %s339_s15  }
  0x1a   : > { %p11_p4 = scmp.ge.s32.totalorder %s14_s15, 4  }
  0x1c   :  { %13 = sbr.rel (!%p11_p4) target bundleno = 1 (0x1), region = 69 }

// kernel: basic_block_1d.3
= control target key start
LH: loop header
LB: loop body
LE: loop exit
PB: predicated region body
PF: predicated region fallthrough
CT: control target
= control target key end

     0   :  { %s752_s12 = smov 0   ;;  %s849_s0 = inlined_call_operand.vmem [shape: bf16[2,16,128], index: 0, kind: input, shape index: {}]   ;;  %s850_s1 = inlined_call_operand.vmem [shape: bf16[384,128], index: 1, kind: input, shape index: {}]   ;;  %s851_s2 = inlined_call_operand.vmem [shape: f32[2,16,128], index: 2, kind: output, shape index: {0}]   ;;  %s852_s3 = inlined_call_operand.vmem [shape: f32[2,2,128], index: 3, kind: output, shape index: {1}]  }
   0x1 LB: > { %s566_s13 = sadd.s32 4294967295, %s729_s12   ;;  %p570_p0 = scmp.ge.s32.totalorder %s729_s12, 1  ;;  %s729_s12 = sphi %s752_s12, %s14_s12  }
   0x2   : > { %p140_p1 = scmp.lt.s32.totalorder %s729_s12, 3 }
   0x4   : > { %p141_p2 = pnand %p570_p0, %p140_p1 }
   0x5   : > { %p168_p3 = scmp.lt.s32.totalorder (!%p141_p2), %s566_s13, 1 }
   0x6   : > { %144 = sbr.rel (%p141_p2) target bundleno = 204 (0xcc), region = 28 }
   0xb   : > { %v691_v0 = vld [vmem:[%s850_s1 + $0x38] sm:$0xff]  ;;  %v690_v3 = vld [vmem:[%s850_s1 + $0x30] sm:$0xff]  ;;  %s854_s13 = smov (!%p168_p3, %s566_s13), 1  ;;  %v689_v6 = vld [vmem:[%s850_s1 + $0x28] sm:$0xff]  ;;  %v186_v16 = vlaneseq  ;;  %vm731_vm4 = vmmov 1  }
   0xc   : > { %v699_v1 = vld [vmem:[%s850_s1 + $0x78] sm:$0xff]  ;;  %410 = vmatpush.bf16.msra.mxu0 %v691_v0  ;;  %v698_v4 = vld [vmem:[%s850_s1 + $0x70] sm:$0xff]  ;;  %v697_v7 = vld [vmem:[%s850_s1 + $0x68] sm:$0xff]  ;;  %s682_s5 = sshll.u32 %s854_s13, 3  ;;  %s575_s20 = sshll.u32 %s854_s13, 1 }
   0xd   : > { %v707_v2 = vld [vmem:[%s850_s1 + $0xb8] sm:$0xff]  ;;  %424 = vmatpush.bf16.msra.mxu1 %v699_v1  ;;  %v706_v5 = vld [vmem:[%s850_s1 + $0xb0] sm:$0xff]  ;;  %v705_v8 = vld [vmem:[%s850_s1 + $0xa8] sm:$0xff]  ;;  %s172_s16 = scalar_lea.vmem %s849_s0, %s682_s5  ;;  %v187_v22 = vshrl.u32 %v186_v16, 7  ;;  %s181_s23 = scalar_lea.vmem %s852_s3, %s575_s20 }
   0xe   : > { %438 = vmatpush.bf16.msra.mxu2 %v707_v2  ;;  %v688_v9 = vld [vmem:[%s850_s1 + $0x20] sm:$0xff]  ;;  %v687_v12 = vld [vmem:[%s850_s1 + $0x18] sm:$0xff]  ;;  %v686_v17 = vld [vmem:[%s850_s1 + $0x10] sm:$0xff] }
   0xf   : > { %v696_v10 = vld [vmem:[%s850_s1 + $0x60] sm:$0xff]  ;;  %v695_v13 = vld [vmem:[%s850_s1 + $0x58] sm:$0xff]  ;;  %v694_v18 = vld [vmem:[%s850_s1 + $0x50] sm:$0xff]  ;;  %vm191_vm0 = vcmp.lt.s32.totalorder %v187_v22, 1  ;;  %v188_v30 = vadd.s32 8, %v187_v22  ;;  %vm204_vm1 = vcmp.lt.s32.totalorder %v187_v22, 7 }
  0x10   : > { %411 = vmatpush.bf16.msra.mxu0 %v690_v3  ;;  %v704_v11 = vld [vmem:[%s850_s1 + $0xa0] sm:$0xff]  ;;  %v703_v14 = vld [vmem:[%s850_s1 + $0x98] sm:$0xff]  ;;  %v702_v21 = vld [vmem:[%s850_s1 + $0x90] sm:$0xff]  ;;  %vm712_vm2 = vcmp.ne.s32.totalorder %v187_v22, 0 }
  0x11   : > { %425 = vmatpush.bf16.msra.mxu1 %v698_v4  ;;  %v709_v15 = vld [vmem:[%s172_s16] sm:$0xff]   ;;  %v685_v23 = vld [vmem:[%s850_s1 + $0x8] sm:$0xff]  ;;  %vm713_vm3 = vcmp.lt.s32.totalorder %v188_v30, 15  ;;  %vm673_vm5 = vmpackc.low %vm731_vm4, %vm712_vm2  ;;  %s683_s16 = sshll.u32 %s854_s13, 4 }
  0x12   : > { %439 = vmatpush.bf16.msra.mxu2 %v706_v5  ;;  %v710_v19 = vunpack.c.l.bf16 %v709_v15  ;;  %v711_v20 = vunpack.c.h.bf16 %v709_v15  ;;  %v693_v24 = vld [vmem:[%s850_s1 + $0x48] sm:$0xff]  ;;  %v684_v31 = vld [vmem:[%s850_s1] sm:$0xff]  ;;  %vm677_vm6 = vmpackc.low %vm713_vm3, %vm731_vm4  ;;  %s177_s19 = scalar_lea.vmem %s851_s2, %s683_s16 }
  0x13   : > { %v701_v27 = vld [vmem:[%s850_s1 + $0x88] sm:$0xff]  ;;  %v692_v32 = vld [vmem:[%s850_s1 + $0x40] sm:$0xff] }
  0x14   : > { %412 = vmatpush.bf16.msra.mxu0 %v689_v6  ;;  %v189_v25 = vrot.slane %v710_v19, 7  ;;  %v190_v26 = vrot.slane %v711_v20, 7  ;;  %v202_v28 = vrot.slane %v710_v19, 1  ;;  %v203_v29 = vrot.slane %v711_v20, 1  ;;  %v700_v35 = vld [vmem:[%s850_s1 + $0x80] sm:$0xff] }
  0x15   : > { %426 = vmatpush.bf16.msra.mxu1 %v697_v7 }
  0x16   : > { %440 = vmatpush.bf16.msra.mxu2 %v705_v8  ;;  %v192_v33 = vsel %vm191_vm0, %v189_v25, %v190_v26  ;;  %v193_v34 = vsel %vm191_vm0, %v190_v26, %v189_v25  ;;  %v205_v36 = vsel %vm204_vm1, %v202_v28, %v203_v29  ;;  %v206_v37 = vsel %vm204_vm1, %v203_v29, %v202_v28 }
  0x17   : > { %v674_v38 = vpack.c.bf16 %v192_v33, %v193_v34  ;;  %v678_v39 = vpack.c.bf16 %v206_v37, %v205_v36 }
  0x18   : > { %413 = vmatpush.bf16.msra.mxu0 %v688_v9 }
  0x19   : > { %427 = vmatpush.bf16.msra.mxu1 %v696_v10 }
  0x1a   : > { %441 = vmatpush.bf16.msra.mxu2 %v704_v11 }
  0x1c   : > { %414 = vmatpush.bf16.msra.mxu0 %v687_v12 }
  0x1d   : > { %428 = vmatpush.bf16.msra.mxu1 %v695_v13 }
  0x1e   : > { %442 = vmatpush.bf16.msra.mxu2 %v703_v14 }
  0x20   : > { %415 = vmatpush.bf16.msra.mxu0 %v686_v17 }
  0x21   : > { %429 = vmatpush.bf16.msra.mxu1 %v694_v18 }
  0x22   : > { %443 = vmatpush.bf16.msra.mxu2 %v702_v21 }
  0x24   : > { %416 = vmatpush.bf16.msra.mxu0 %v685_v23 }
  0x25   : > { %430 = vmatpush.bf16.msra.mxu1 %v693_v24 }
  0x26   : > { %444 = vmatpush.bf16.msra.mxu2 %v701_v27 }
  0x28   : > { %417 = vmatpush.bf16.msra.mxu0 %v684_v31 }
  0x29   : > { %431 = vmatpush.bf16.msra.mxu1 %v692_v32 }
  0x2a   : > { %445 = vmatpush.bf16.msra.mxu2 %v700_v35 }
  0x2b   : > { %675 = vmatmul.msk.bf16.vlgmr.msra.gmra.mxu0 %vm673_vm5, %v674_v38 }
  0x2c   : > { %432 = vmatmul.bf16.vlgmr.msra.gmra.mxu1 %v709_v15 }
  0x2d   : > { %679 = vmatmul.msk.bf16.vlgmr.msra.gmra.mxu2 %vm677_vm6, %v678_v39 }
  0xa8   : > { %v419_v40 = vpop.f32.mrf.mxu0 }
  0xa9   : > { %v433_v41 = vpop.f32.mrf.mxu1 }
  0xaa   : > { %v434_v42 = vadd.f32 %v433_v41, %v419_v40 }
  0xb0   : > { %v447_v43 = vpop.f32.mrf.mxu2  ;;  %v421_v45 = vpop.f32.mrf.mxu0 }
  0xb1   : > { %v448_v44 = vadd.f32 %v447_v43, %v434_v42  ;;  %v435_v46 = vpop.f32.mrf.mxu1 }
  0xb2   : > { %v436_v47 = vadd.f32 %v435_v46, %v421_v45 }
  0xb3   : > { %452 = vst [vmem:[%s177_s19] sm:$0xff] %v448_v44  ;;  %v470_v50 = vmul.f32 %v448_v44, %v448_v44 }
  0xb8   : > { %v449_v48 = vpop.f32.mrf.mxu2 }
  0xb9   : > { %v450_v49 = vadd.f32 %v449_v48, %v436_v47 }
  0xbb   : > { %453 = vst [vmem:[%s177_s19 + $0x8] sm:$0xff] %v450_v49  ;;  %v462_v51 = vadd.f32 %v450_v49, %v448_v44  ;;  %v471_v52 = vmul.f32 %v450_v49, %v450_v49 }
  0xbd   : > { %v463_v53 = vrot.slane %v462_v51, 4  ;;  %v472_v54 = vadd.f32 %v471_v52, %v470_v50 }
  0xbf   : > { %v464_v55 = vadd.f32 %v463_v53, %v462_v51  ;;  %v473_v56 = vrot.slane %v472_v54, 4 }
  0xc1   : > { %v465_v57 = vrot.slane %v464_v55, 2  ;;  %v474_v58 = vadd.f32 %v473_v56, %v472_v54 }
  0xc3   : > { %v466_v59 = vadd.f32 %v465_v57, %v464_v55  ;;  %v475_v60 = vrot.slane %v474_v58, 2 }
  0xc5   : > { %v467_v61 = vrot.slane %v466_v59, 1  ;;  %v476_v62 = vadd.f32 %v475_v60, %v474_v58 }
  0xc7   : > { %v468_v63 = vadd.f32 %v467_v61, %v466_v59  ;;  %v477_v0 = vrot.slane %v476_v62, 1 }
  0xc9   : > { %469 = vst [vmem:[%s181_s23] sm:$0x1] %v468_v63  ;;  %v478_v1 = vadd.f32 %v477_v0, %v476_v62 }
  0xcb   : > { %479 = vst [vmem:[%s181_s23 + $0x1] sm:$0x1] %v478_v1 }
  0xcc PF: > { %s14_s12 = sadd.s32 1, %s729_s12  }
  0xcd   : > { %p11_p4 = scmp.ge.s32.totalorder %s14_s12, 4  }
  0xcf   :  { %13 = sbr.rel (!%p11_p4) target bundleno = 1 (0x1), region = 70 }

// kernel: basic_block_1d.4
= control target key start
LH: loop header
LB: loop body
LE: loop exit
PB: predicated region body
PF: predicated region fallthrough
CT: control target
= control target key end

     0   :  { %s826_s18 = smov 0   ;;  %s932_s0 = inlined_call_operand.vmem [shape: f32[2,16,128], index: 0, kind: input, shape index: {}]   ;;  %s933_s1 = inlined_call_operand.vmem [shape: f32[1,128], index: 1, kind: input, shape index: {}]   ;;  %s934_s2 = inlined_call_operand.vmem [shape: f32[1,128], index: 2, kind: input, shape index: {}]   ;;  %s935_s3 = inlined_call_operand.vmem [shape: bf16[384,128], index: 3, kind: input, shape index: {}]   ;;  %s936_s4 = inlined_call_operand.vmem [shape: f32[2,16,128], index: 4, kind: output, shape index: {0}]   ;;  %s937_s5 = inlined_call_operand.vmem [shape: f32[2,2,128], index: 5, kind: output, shape index: {1}]  }
   0x1 LB: > { %s632_s19 = sadd.s32 4294967295, %s793_s18   ;;  %p636_p0 = scmp.ge.s32.totalorder %s793_s18, 1  ;;  %s793_s18 = sphi %s826_s18, %s16_s18  }
   0x2   : > { %p190_p1 = scmp.lt.s32.totalorder %s793_s18, 3 }
   0x4   : > { %p191_p2 = pnand %p636_p0, %p190_p1 }
   0x5   : > { %p222_p3 = scmp.lt.s32.totalorder (!%p191_p2), %s632_s19, 1 }
   0x6   : > { %194 = sbr.rel (%p191_p2) target bundleno = 204 (0xcc), region = 36 }
   0xb   : > { %v757_v0 = vld [vmem:[%s935_s3 + $0x38] sm:$0xff]  ;;  %v756_v3 = vld [vmem:[%s935_s3 + $0x30] sm:$0xff]  ;;  %s939_s19 = smov (!%p222_p3, %s632_s19), 1  ;;  %v755_v6 = vld [vmem:[%s935_s3 + $0x28] sm:$0xff]  ;;  %v252_v23 = vlaneseq  ;;  %vm795_vm4 = vmmov 1  }
   0xc   : > { %v765_v1 = vld [vmem:[%s935_s3 + $0x78] sm:$0xff]  ;;  %476 = vmatpush.bf16.msra.mxu0 %v757_v0  ;;  %v764_v4 = vld [vmem:[%s935_s3 + $0x70] sm:$0xff]  ;;  %s748_s7 = sshll.u32 %s939_s19, 4  ;;  %v763_v7 = vld [vmem:[%s935_s3 + $0x68] sm:$0xff] }
   0xd   : > { %v773_v2 = vld [vmem:[%s935_s3 + $0xb8] sm:$0xff]  ;;  %490 = vmatpush.bf16.msra.mxu1 %v765_v1  ;;  %v772_v5 = vld [vmem:[%s935_s3 + $0xb0] sm:$0xff]  ;;  %s226_s10 = scalar_lea.vmem %s932_s0, %s748_s7  ;;  %v771_v8 = vld [vmem:[%s935_s3 + $0xa8] sm:$0xff]  ;;  %v253_v29 = vshrl.u32 %v252_v23, 7  ;;  %s231_s9 = scalar_lea.vmem %s936_s4, %s748_s7 }
   0xe   : > { %504 = vmatpush.bf16.msra.mxu2 %v773_v2  ;;  %v236_v9 = vld [vmem:[%s226_s10] sm:$0xff]  ;;  %v237_v10 = vld [vmem:[%s226_s10 + $0x8] sm:$0xff]  ;;  %v753_v18 = vld [vmem:[%s935_s3 + $0x18] sm:$0xff]  ;;  %s641_s7 = sshll.u32 %s939_s19, 1 }
   0xf   : > { %v785_v11 = vld [vmem:[%s933_s1] ss:$0 sm:$0xff]  ;;  %v761_v19 = vld [vmem:[%s935_s3 + $0x58] sm:$0xff]  ;;  %v752_v24 = vld [vmem:[%s935_s3 + $0x10] sm:$0xff]  ;;  %vm257_vm0 = vcmp.lt.s32.totalorder %v253_v29, 1  ;;  %v254_v37 = vadd.s32 8, %v253_v29  ;;  %s235_s12 = scalar_lea.vmem %s937_s5, %s641_s7 }
  0x10   : > { %477 = vmatpush.bf16.msra.mxu0 %v756_v3  ;;  %v754_v12 = vld [vmem:[%s935_s3 + $0x20] sm:$0xff]  ;;  %v242_v16 = vmul.f32 %v785_v11, %v236_v9  ;;  %v243_v17 = vmul.f32 %v785_v11, %v237_v10  ;;  %v769_v22 = vld [vmem:[%s935_s3 + $0x98] sm:$0xff]  ;;  %v760_v25 = vld [vmem:[%s935_s3 + $0x50] sm:$0xff]  ;;  %vm270_vm1 = vcmp.lt.s32.totalorder %v253_v29, 7  ;;  %vm774_vm2 = vcmp.ne.s32.totalorder %v253_v29, 0 }
  0x11   : > { %491 = vmatpush.bf16.msra.mxu1 %v764_v4  ;;  %v762_v13 = vld [vmem:[%s935_s3 + $0x60] sm:$0xff]  ;;  %v768_v28 = vld [vmem:[%s935_s3 + $0x90] sm:$0xff]  ;;  %v751_v30 = vld [vmem:[%s935_s3 + $0x8] sm:$0xff]  ;;  %vm775_vm3 = vcmp.lt.s32.totalorder %v254_v37, 15 }
  0x12   : > { %505 = vmatpush.bf16.msra.mxu2 %v772_v5  ;;  %v786_v14 = vld [vmem:[%s934_s2] ss:$0 sm:$0xff]  ;;  %v759_v31 = vld [vmem:[%s935_s3 + $0x48] sm:$0xff]  ;;  %vm739_vm5 = vmpackc.low %vm795_vm4, %vm774_vm2 }
  0x13   : > { %v770_v15 = vld [vmem:[%s935_s3 + $0xa0] sm:$0xff]  ;;  %v248_v20 = vadd.f32 %v786_v14, %v242_v16  ;;  %v249_v21 = vadd.f32 %v786_v14, %v243_v17  ;;  %v767_v34 = vld [vmem:[%s935_s3 + $0x88] sm:$0xff]  ;;  %vm743_vm6 = vmpackc.low %vm775_vm3, %vm795_vm4 }
  0x14   : > { %478 = vmatpush.bf16.msra.mxu0 %v755_v6  ;;  %v750_v38 = vld [vmem:[%s935_s3] sm:$0xff] }
  0x15   : > { %492 = vmatpush.bf16.msra.mxu1 %v763_v7  ;;  %v250_v26 = vmax.f32 %v248_v20, 0.0  ;;  %v251_v27 = vmax.f32 %v249_v21, 0.0  ;;  %v758_v39 = vld [vmem:[%s935_s3 + $0x40] sm:$0xff] }
  0x16   : > { %506 = vmatpush.bf16.msra.mxu2 %v771_v8  ;;  %v766_v42 = vld [vmem:[%s935_s3 + $0x80] sm:$0xff] }
  0x17   : > { %v255_v32 = vrot.slane %v250_v26, 7  ;;  %v256_v33 = vrot.slane %v251_v27, 7  ;;  %v268_v35 = vrot.slane %v250_v26, 1  ;;  %v269_v36 = vrot.slane %v251_v27, 1 }
  0x18   : > { %479 = vmatpush.bf16.msra.mxu0 %v754_v12  ;;  %v282_v46 = vpack.c.bf16 %v251_v27, %v250_v26 }
  0x19   : > { %493 = vmatpush.bf16.msra.mxu1 %v762_v13  ;;  %v258_v40 = vsel %vm257_vm0, %v255_v32, %v256_v33  ;;  %v259_v41 = vsel %vm257_vm0, %v256_v33, %v255_v32  ;;  %v271_v43 = vsel %vm270_vm1, %v268_v35, %v269_v36  ;;  %v272_v44 = vsel %vm270_vm1, %v269_v36, %v268_v35 }
  0x1a   : > { %507 = vmatpush.bf16.msra.mxu2 %v770_v15  ;;  %v740_v45 = vpack.c.bf16 %v258_v40, %v259_v41  ;;  %v744_v47 = vpack.c.bf16 %v272_v44, %v271_v43 }
  0x1c   : > { %480 = vmatpush.bf16.msra.mxu0 %v753_v18 }
  0x1d   : > { %494 = vmatpush.bf16.msra.mxu1 %v761_v19 }
  0x1e   : > { %508 = vmatpush.bf16.msra.mxu2 %v769_v22 }
  0x20   : > { %481 = vmatpush.bf16.msra.mxu0 %v752_v24 }
  0x21   : > { %495 = vmatpush.bf16.msra.mxu1 %v760_v25 }
  0x22   : > { %509 = vmatpush.bf16.msra.mxu2 %v768_v28 }
  0x24   : > { %482 = vmatpush.bf16.msra.mxu0 %v751_v30 }
  0x25   : > { %496 = vmatpush.bf16.msra.mxu1 %v759_v31 }
  0x26   : > { %510 = vmatpush.bf16.msra.mxu2 %v767_v34 }
  0x28   : > { %483 = vmatpush.bf16.msra.mxu0 %v750_v38 }
  0x29   : > { %497 = vmatpush.bf16.msra.mxu1 %v758_v39 }
  0x2a   : > { %511 = vmatpush.bf16.msra.mxu2 %v766_v42 }
  0x2b   : > { %741 = vmatmul.msk.bf16.vlgmr.msra.gmra.mxu0 %vm739_vm5, %v740_v45 }
  0x2c   : > { %498 = vmatmul.bf16.vlgmr.msra.gmra.mxu1 %v282_v46 }
  0x2d   : > { %745 = vmatmul.msk.bf16.vlgmr.msra.gmra.mxu2 %vm743_vm6, %v744_v47 }
  0xa8   : > { %v485_v48 = vpop.f32.mrf.mxu0 }
  0xa9   : > { %v499_v49 = vpop.f32.mrf.mxu1 }
  0xaa   : > { %v500_v50 = vadd.f32 %v499_v49, %v485_v48 }
  0xb0   : > { %v513_v51 = vpop.f32.mrf.mxu2  ;;  %v487_v53 = vpop.f32.mrf.mxu0 }
  0xb1   : > { %v514_v52 = vadd.f32 %v513_v51, %v500_v50  ;;  %v501_v54 = vpop.f32.mrf.mxu1 }
  0xb2   : > { %v502_v55 = vadd.f32 %v501_v54, %v487_v53 }
  0xb3   : > { %518 = vst [vmem:[%s231_s9] sm:$0xff] %v514_v52  ;;  %v536_v58 = vmul.f32 %v514_v52, %v514_v52 }
  0xb8   : > { %v515_v56 = vpop.f32.mrf.mxu2 }
  0xb9   : > { %v516_v57 = vadd.f32 %v515_v56, %v502_v55 }
  0xbb   : > { %519 = vst [vmem:[%s231_s9 + $0x8] sm:$0xff] %v516_v57  ;;  %v528_v59 = vadd.f32 %v516_v57, %v514_v52  ;;  %v537_v60 = vmul.f32 %v516_v57, %v516_v57 }
  0xbd   : > { %v529_v61 = vrot.slane %v528_v59, 4  ;;  %v538_v62 = vadd.f32 %v537_v60, %v536_v58 }
  0xbf   : > { %v530_v63 = vadd.f32 %v529_v61, %v528_v59  ;;  %v539_v0 = vrot.slane %v538_v62, 4 }
  0xc1   : > { %v531_v1 = vrot.slane %v530_v63, 2  ;;  %v540_v2 = vadd.f32 %v539_v0, %v538_v62 }
  0xc3   : > { %v532_v3 = vadd.f32 %v531_v1, %v530_v63  ;;  %v541_v4 = vrot.slane %v540_v2, 2 }
  0xc5   : > { %v533_v5 = vrot.slane %v532_v3, 1  ;;  %v542_v6 = vadd.f32 %v541_v4, %v540_v2 }
  0xc7   : > { %v534_v7 = vadd.f32 %v533_v5, %v532_v3  ;;  %v543_v8 = vrot.slane %v542_v6, 1 }
  0xc9   : > { %535 = vst [vmem:[%s235_s12] sm:$0x1] %v534_v7  ;;  %v544_v9 = vadd.f32 %v543_v8, %v542_v6 }
  0xcb   : > { %545 = vst [vmem:[%s235_s12 + $0x1] sm:$0x1] %v544_v9 }
  0xcc PF: > { %s16_s18 = sadd.s32 1, %s793_s18  }
  0xcd   : > { %p13_p4 = scmp.ge.s32.totalorder %s16_s18, 4  }
  0xcf   :  { %15 = sbr.rel (!%p13_p4) target bundleno = 1 (0x1), region = 78 }

</bundles_post_ra>
